<compile_context>
chip_gen: v7x
topology: tpu7x:2x2x1
jax: 0.10.0
libtpu: 0.0.40
codegen_flags: <defaults>
</compile_context>

<pallas_src>
import functools
import math

import jax
import jax.numpy as jnp
from jax import lax
from jax.experimental import pallas as pl
from jax.experimental.pallas import tpu as pltpu


# ----------------------------------------------------------------------------
# Pallas kernel: fused  conv(1x3) -> ReLU -> conv(1x3)  for BOTH heads on a
# tile of rows (all levels stacked on the row axis).
# ----------------------------------------------------------------------------
def head_kernel(x_ref, mask_ref, w1_ref, b1_ref, w2_ref, b2_ref,
                o_ref, hpad_ref, *, W):
    # x_ref   : (tb, W+2, Cin)  bf16, zero-padded along W (conv pad + level pad)
    # mask_ref: (tb, W, 1)      f32, 1.0 on valid columns of each row's level
    # w1_ref  : (3*Cin, Ch2)    bf16   (cls | reg conv1, concatenated on Cout)
    # b1_ref  : (1, Ch2)        f32
    # w2_ref  : (3*Ch2, Cout)   bf16   (block-diagonal: cls_logits | bbox_reg)
    # b2_ref  : (1, Cout)       f32
    # o_ref   : (tb, W, Cout)   f32
    # hpad_ref: (tb, W+2, Ch2)  bf16 scratch (same-padded hidden activation)
    tb, _, Cin = x_ref.shape
    Ch2 = hpad_ref.shape[-1]
    Cout = o_ref.shape[-1]

    # ---- conv1 (both heads fused on Cout): im2col over 3 taps -> one matmul
    patches1 = jnp.concatenate(
        [x_ref[:, 0:W, :], x_ref[:, 1:W + 1, :], x_ref[:, 2:W + 2, :]],
        axis=-1)                                             # (tb, W, 3*Cin)
    h = jnp.dot(patches1.reshape(tb * W, 3 * Cin), w1_ref[...],
                preferred_element_type=jnp.float32)          # (tb*W, Ch2) f32
    h = jnp.maximum(h + b1_ref[...], 0.0)                    # bias + ReLU (f32)
    h = h.reshape(tb, W, Ch2) * mask_ref[...]                # zero level padding

    # ---- same-padded hidden activation kept in a VMEM scratch
    zcol = jnp.zeros((tb, 1, Ch2), hpad_ref.dtype)
    hpad_ref[:, 0:1, :] = zcol
    hpad_ref[:, W + 1:W + 2, :] = zcol
    hpad_ref[:, 1:W + 1, :] = h.astype(hpad_ref.dtype)       # bf16 into MXU path

    # ---- conv2 (cls_logits | bbox_reg via block-diagonal weights): one matmul
    patches2 = jnp.concatenate(
        [hpad_ref[:, 0:W, :], hpad_ref[:, 1:W + 1, :], hpad_ref[:, 2:W + 2, :]],
        axis=-1)                                             # (tb, W, 3*Ch2)
    y = jnp.dot(patches2.reshape(tb * W, 3 * Ch2), w2_ref[...],
                preferred_element_type=jnp.float32)          # (tb*W, Cout) f32
    y = y + b2_ref[...]
    o_ref[...] = y.reshape(tb, W, Cout)


def _choose_tb(B, Wmax):
    """Row tile: take all rows at once when small, else an 8-aligned divisor
    of B that makes the matmul M dim (tb*Wmax) >= 1024."""
    if B * Wmax <= 8192:
        return B
    for tb in range(8, B, 8):
        if B % tb == 0 and tb * Wmax >= 1024:
            return tb
    return B


def run_fused_head(rows_pad, mask, w1, b1, w2, b2, *, Wmax):
    """rows_pad: (B, Wmax+2, Cin) bf16.  Returns (B, Wmax, Cout) f32."""
    B, Wp2, Cin = rows_pad.shape
    assert Wp2 == Wmax + 2
    K1, Ch2 = w1.shape
    K2, Cout = w2.shape
    assert K1 == 3 * Cin and K2 == 3 * Ch2

    tb = _choose_tb(B, Wmax)
    assert B % tb == 0
    grid = (B // tb,)

    kernel = functools.partial(head_kernel, W=Wmax)

    return pl.pallas_call(
        kernel,
        out_shape=jax.ShapeDtypeStruct((B, Wmax, Cout), jnp.float32),
        grid_spec=pltpu.PrefetchScalarGridSpec(
            num_scalar_prefetch=0,
            grid=grid,
            in_specs=[
                pl.BlockSpec((tb, Wp2, Cin), lambda i: (i, 0, 0)),
                pl.BlockSpec((tb, Wmax, 1), lambda i: (i, 0, 0)),
                pl.BlockSpec((K1, Ch2), lambda i: (0, 0)),
                pl.BlockSpec((1, Ch2), lambda i: (0, 0)),
                pl.BlockSpec((K2, Cout), lambda i: (0, 0)),
                pl.BlockSpec((1, Cout), lambda i: (0, 0)),
            ],
            out_specs=pl.BlockSpec((tb, Wmax, Cout), lambda i: (i, 0, 0)),
            scratch_shapes=[pltpu.VMEM((tb, Wp2, Ch2), jnp.bfloat16)],
        ),
        compiler_params=pltpu.CompilerParams(
            dimension_semantics=("parallel",)),
    )(rows_pad, mask, w1, b1, w2, b2)


# ----------------------------------------------------------------------------
# Weight fusion helpers + wrapper (reshape glue identical to PyTorch's
# permute/reshape convention).
# ----------------------------------------------------------------------------
def _block_diag_w2(cls_w2, reg_w2):
    """cls_w2: (3, Ch, Kc), reg_w2: (3, Ch, Kr) -> (3*2*Ch, Kc+Kr) block-diag."""
    _, Ch, Kc = cls_w2.shape
    Kr = reg_w2.shape[-1]
    w2 = jnp.zeros((3 * 2 * Ch, Kc + Kr), jnp.float32)
    for t in range(3):
        w2 = w2.at[t * 2 * Ch:t * 2 * Ch + Ch, :Kc].set(cls_w2[t])
        w2 = w2.at[t * 2 * Ch + Ch:(t + 1) * 2 * Ch, Kc:].set(reg_w2[t])
    return w2


def retinanet_head_forward(features_nchw, params, num_classes, num_output_points):
    """RetinaNetHead.forward: one pallas_call over all levels and both heads."""
    N, C, H, _ = features_nchw[0].shape
    A = params["num_anchors"]
    Kc, Kr = A * num_classes, A * num_output_points
    Ws = [int(x.shape[3]) for x in features_nchw]
    Wmax = max(Ws)

    # Stack all levels' rows (rows are independent for a (1,3) conv); pad every
    # level's W to Wmax and build a validity mask for the second conv's padding.
    rows_list, mask_list = [], []
    for x, W in zip(features_nchw, Ws):
        rows = jnp.transpose(x, (0, 2, 3, 1)).reshape(N * H, W, C)
        rows_list.append(jnp.pad(rows, ((0, 0), (1, 1 + Wmax - W), (0, 0))))
        valid = (jnp.arange(Wmax) < W).astype(jnp.float32)
        mask_list.append(jnp.broadcast_to(valid[None, :, None], (N * H, Wmax, 1)))
    rows_all = jnp.concatenate(rows_list, axis=0).astype(jnp.bfloat16)
    mask_all = jnp.concatenate(mask_list, axis=0)

    # Fuse the two heads: conv1 concatenated on Cout, conv2 block-diagonal.
    w1 = jnp.concatenate([params["cls_w1"].reshape(3 * C, C),
                          params["reg_w1"].reshape(3 * C, C)], axis=1)
    b1 = jnp.concatenate([params["cls_b1"], params["reg_b1"]], axis=1)
    w2 = _block_diag_w2(params["cls_w2"], params["reg_w2"])
    b2 = jnp.concatenate([params["cls_b2"], params["reg_b2"]], axis=1)

    y = run_fused_head(rows_all, mask_all,
                       w1.astype(jnp.bfloat16), b1,
                       w2.astype(jnp.bfloat16), b2, Wmax=Wmax)  # (Btot, Wmax, Kc+Kr)

    # PyTorch: view(N, A, K, H, W).permute(0,3,4,1,2).reshape(N, H*W*A, K)
    cls_out, reg_out, off = [], [], 0
    for W in Ws:
        yl = y[off:off + N * H, :W, :].reshape(N, H, W, Kc + Kr)
        off += N * H
        cls_out.append(yl[..., :Kc].reshape(N, H * W * A, num_classes))
        reg_out.append(yl[..., Kc:].reshape(N, H * W * A, num_output_points))
    return {"cls_logits": jnp.concatenate(cls_out, axis=1),
            "bbox_regression": jnp.concatenate(reg_out, axis=1)}


def retinanet_forward(features_nchw, params, num_classes, num_output_points):
    """RetinaNet.forward: returns (features, head_outputs, anchors)."""
    head_outputs = retinanet_head_forward(
        features_nchw, params, num_classes, num_output_points)

    # TODO(synk): anchor_generator is an externally injected module in the
    # PyTorch code; emit simple deterministic [left, right] line-anchors here.
    N = features_nchw[0].shape[0]
    A = params["num_anchors"]
    anchors_per_level = []
    for x in features_nchw:
        W = x.shape[3]
        centers = jnp.repeat(jnp.arange(W, dtype=jnp.float32), A)
        widths = jnp.tile(jnp.arange(1, A + 1, dtype=jnp.float32), W)
        anchors_per_level.append(
            jnp.stack([centers - widths / 2, centers + widths / 2], axis=-1))
    anchors_one_image = jnp.concatenate(anchors_per_level, axis=0)
    anchors = [anchors_one_image for _ in range(N)]
    return features_nchw, head_outputs, anchors


# ----------------------------------------------------------------------------
# Pure-JAX reference (lax.conv, f32) for correctness checking.
# ----------------------------------------------------------------------------
def ref_head_per_level(x_nchw, w1, b1, w2, b2, K):
    def conv(x, w, b):
        w_oihw = jnp.transpose(w, (2, 1, 0))[:, :, None, :]   # (Cout, Cin, 1, 3)
        y = lax.conv_general_dilated(
            x, w_oihw, window_strides=(1, 1), padding=((0, 0), (1, 1)),
            dimension_numbers=("NCHW", "OIHW", "NCHW"))
        return y + b.reshape(1, -1, 1, 1)
    h = jnp.maximum(conv(x_nchw, w1, b1), 0.0)
    y = conv(h, w2, b2)                                        # (N, A*K, H, W)
    N, AK, H, W = y.shape
    A = AK // K
    y = y.reshape(N, A, K, H, W).transpose(0, 3, 4, 1, 2)
    return y.reshape(N, H * W * A, K)


# ----------------------------------------------------------------------------
def make_params(key, in_channels, num_anchors, num_classes, num_output_points,
                prior_probability=0.01):
    ks = jax.random.split(key, 4)
    std = 0.01
    C, A = in_channels, num_anchors
    params = {
        "num_anchors": num_anchors,
        # classification head
        "cls_w1": std * jax.random.normal(ks[0], (3, C, C), jnp.float32),
        "cls_b1": jnp.zeros((1, C), jnp.float32),
        "cls_w2": std * jax.random.normal(ks[1], (3, C, A * num_classes), jnp.float32),
        "cls_b2": jnp.full((1, A * num_classes),
                           -math.log((1.0 - prior_probability) / prior_probability),
                           jnp.float32),
        # regression head
        "reg_w1": std * jax.random.normal(ks[2], (3, C, C), jnp.float32),
        "reg_b1": jnp.zeros((1, C), jnp.float32),
        "reg_w2": std * jax.random.normal(ks[3], (3, C, A * num_output_points), jnp.float32),
        "reg_b2": jnp.zeros((1, A * num_output_points), jnp.float32),
    }
    return params


if __name__ == "__main__":
    key = jax.random.PRNGKey(0)
    N, C, H = 2, 32, 1            # deepmrm XIC data: H == 1
    num_anchors, num_classes, num_output_points = 3, 2, 2
    level_widths = [16, 8]        # two feature-pyramid levels

    k_feat, k_par = jax.random.split(key)
    feat_keys = jax.random.split(k_feat, len(level_widths))
    # TODO(synk): backbone is an externally injected module; use synthetic
    # feature maps directly (NCHW, as the backbone would produce).
    features = [jax.random.normal(fk, (N, C, H, W), jnp.float32)
                for fk, W in zip(feat_keys, level_widths)]

    params = make_params(k_par, C, num_anchors, num_classes, num_output_points)

    feats_out, head_outputs, anchors = retinanet_forward(
        features, params, num_classes, num_output_points)
    jax.block_until_ready(head_outputs)

    # correctness check against a pure-JAX f32 lax.conv reference
    cls_ref = jnp.concatenate(
        [ref_head_per_level(x, params["cls_w1"], params["cls_b1"],
                            params["cls_w2"], params["cls_b2"], num_classes)
         for x in features], axis=1)
    reg_ref = jnp.concatenate(
        [ref_head_per_level(x, params["reg_w1"], params["reg_b1"],
                            params["reg_w2"], params["reg_b2"], num_output_points)
         for x in features], axis=1)

    total_A = sum(H * W * num_anchors for W in level_widths)
    assert head_outputs["cls_logits"].shape == (N, total_A, num_classes)
    assert head_outputs["bbox_regression"].shape == (N, total_A, num_output_points)
    # bf16 MXU inputs with f32 accumulation: relaxed tolerance vs f32 reference
    assert jnp.allclose(head_outputs["cls_logits"], cls_ref, atol=2e-3), "cls mismatch"
    assert jnp.allclose(head_outputs["bbox_regression"], reg_ref, atol=2e-3), "reg mismatch"

    print("KERNEL_OK")
</pallas_src>

<mosaic_0001>
module attributes {stable_mosaic.version = 11 : i64} {
  func.func @head_kernel(%arg0: i32, %arg1: memref<4x18x32xbf16, #tpu.memory_space<vmem>>, %arg2: memref<4x16x1xf32, #tpu.memory_space<vmem>>, %arg3: memref<96x64xbf16, #tpu.memory_space<vmem>>, %arg4: memref<1x64xf32, #tpu.memory_space<vmem>>, %arg5: memref<192x12xbf16, #tpu.memory_space<vmem>>, %arg6: memref<1x12xf32, #tpu.memory_space<vmem>>, %arg7: memref<4x16x12xf32, #tpu.memory_space<vmem>>, %arg8: memref<4x18x64xbf16, #tpu.memory_space<vmem>>) attributes {dimension_semantics = [#tpu.dimension_semantics<parallel>], iteration_bounds = array<i64: 1>, scalar_prefetch = 0 : i64, scratch_operands = 1 : i64, tpu.core_type = #tpu.core_type<tc>, window_params = [{transform_indices = @transform_0, window_bounds = array<i64: 4, 18, 32>}, {transform_indices = @transform_1, window_bounds = array<i64: 4, 16, 1>}, {pipeline_mode = #tpu.pipeline_mode<synchronous>, transform_indices = @transform_2, window_bounds = array<i64: 96, 64>}, {pipeline_mode = #tpu.pipeline_mode<synchronous>, transform_indices = @transform_3, window_bounds = array<i64: 1, 64>}, {pipeline_mode = #tpu.pipeline_mode<synchronous>, transform_indices = @transform_4, window_bounds = array<i64: 192, 12>}, {pipeline_mode = #tpu.pipeline_mode<synchronous>, transform_indices = @transform_5, window_bounds = array<i64: 1, 12>}, {transform_indices = @transform_6, window_bounds = array<i64: 4, 16, 12>}]} {
    %c0 = arith.constant 0 : index
    %c0_0 = arith.constant 0 : index
    %c0_1 = arith.constant 0 : index
    %0 = vector.load %arg1[%c0, %c0_0, %c0_1] : memref<4x18x32xbf16, #tpu.memory_space<vmem>>, vector<4x16x32xbf16>
    %c0_2 = arith.constant 0 : index
    %c1 = arith.constant 1 : index
    %c0_3 = arith.constant 0 : index
    %1 = vector.load %arg1[%c0_2, %c1, %c0_3] : memref<4x18x32xbf16, #tpu.memory_space<vmem>>, vector<4x16x32xbf16>
    %c0_4 = arith.constant 0 : index
    %c2 = arith.constant 2 : index
    %c0_5 = arith.constant 0 : index
    %2 = vector.load %arg1[%c0_4, %c2, %c0_5] : memref<4x18x32xbf16, #tpu.memory_space<vmem>>, vector<4x16x32xbf16>
    %3 = tpu.concatenate %0, %1, %2 in 2 : vector<4x16x32xbf16>, vector<4x16x32xbf16>, vector<4x16x32xbf16> -> vector<4x16x96xbf16>
    %4 = vector.shape_cast %3 : vector<4x16x96xbf16> to vector<64x96xbf16>
    %c0_6 = arith.constant 0 : index
    %c0_7 = arith.constant 0 : index
    %5 = vector.load %arg3[%c0_6, %c0_7] : memref<96x64xbf16, #tpu.memory_space<vmem>>, vector<96x64xbf16>
    %cst = arith.constant dense<0.000000e+00> : vector<64x64xf32>
    %6 = tpu.matmul %4, %5, %cst {dimension_numbers = #tpu.dot_dimension_numbers<[1], [0], [0], [1], [0, 0, 1, 1], [], []>} : vector<64x96xbf16>, vector<96x64xbf16>, vector<64x64xf32> -> vector<64x64xf32>
    %c0_8 = arith.constant 0 : index
    %c0_9 = arith.constant 0 : index
    %7 = vector.load %arg4[%c0_8, %c0_9] : memref<1x64xf32, #tpu.memory_space<vmem>>, vector<1x64xf32>
    %8 = vector.broadcast %7 : vector<1x64xf32> to vector<64x64xf32>
    %9 = arith.addf %6, %8 : vector<64x64xf32>
    %cst_10 = arith.constant 0.000000e+00 : f32
    %10 = vector.broadcast %cst_10 : f32 to vector<64x64xf32>
    %11 = arith.maximumf %9, %10 : vector<64x64xf32>
    %12 = vector.shape_cast %11 : vector<64x64xf32> to vector<4x16x64xf32>
    %c0_11 = arith.constant 0 : index
    %c0_12 = arith.constant 0 : index
    %c0_13 = arith.constant 0 : index
    %13 = vector.load %arg2[%c0_11, %c0_12, %c0_13] : memref<4x16x1xf32, #tpu.memory_space<vmem>>, vector<4x16x1xf32>
    %14 = vector.broadcast %13 : vector<4x16x1xf32> to vector<4x16x64xf32>
    %15 = arith.mulf %12, %14 : vector<4x16x64xf32>
    %cst_14 = arith.constant 0.000000e+00 : bf16
    %16 = vector.broadcast %cst_14 : bf16 to vector<4x1x64xbf16>
    %c0_15 = arith.constant 0 : index
    %c0_16 = arith.constant 0 : index
    %c0_17 = arith.constant 0 : index
    %17 = vector.load %arg8[%c0_15, %c0_16, %c0_17] : memref<4x18x64xbf16, #tpu.memory_space<vmem>>, vector<4x1x64xbf16>
    tpu.vector_store %arg8[%c0_15, %c0_16, %c0_17], %16 {strides = array<i32>} : memref<4x18x64xbf16, #tpu.memory_space<vmem>>, vector<4x1x64xbf16>,
    %c0_18 = arith.constant 0 : index
    %c17 = arith.constant 17 : index
    %c0_19 = arith.constant 0 : index
    %18 = vector.load %arg8[%c0_18, %c17, %c0_19] : memref<4x18x64xbf16, #tpu.memory_space<vmem>>, vector<4x1x64xbf16>
    tpu.vector_store %arg8[%c0_18, %c17, %c0_19], %16 {strides = array<i32>} : memref<4x18x64xbf16, #tpu.memory_space<vmem>>, vector<4x1x64xbf16>,
    %19 = arith.truncf %15 : vector<4x16x64xf32> to vector<4x16x64xbf16>
    %c0_20 = arith.constant 0 : index
    %c1_21 = arith.constant 1 : index
    %c0_22 = arith.constant 0 : index
    %20 = vector.load %arg8[%c0_20, %c1_21, %c0_22] : memref<4x18x64xbf16, #tpu.memory_space<vmem>>, vector<4x16x64xbf16>
    tpu.vector_store %arg8[%c0_20, %c1_21, %c0_22], %19 {strides = array<i32>} : memref<4x18x64xbf16, #tpu.memory_space<vmem>>, vector<4x16x64xbf16>,
    %c0_23 = arith.constant 0 : index
    %c0_24 = arith.constant 0 : index
    %c0_25 = arith.constant 0 : index
    %21 = vector.load %arg8[%c0_23, %c0_24, %c0_25] : memref<4x18x64xbf16, #tpu.memory_space<vmem>>, vector<4x16x64xbf16>
    %c0_26 = arith.constant 0 : index
    %c1_27 = arith.constant 1 : index
    %c0_28 = arith.constant 0 : index
    %22 = vector.load %arg8[%c0_26, %c1_27, %c0_28] : memref<4x18x64xbf16, #tpu.memory_space<vmem>>, vector<4x16x64xbf16>
    %c0_29 = arith.constant 0 : index
    %c2_30 = arith.constant 2 : index
    %c0_31 = arith.constant 0 : index
    %23 = vector.load %arg8[%c0_29, %c2_30, %c0_31] : memref<4x18x64xbf16, #tpu.memory_space<vmem>>, vector<4x16x64xbf16>
    %24 = tpu.concatenate %21, %22, %23 in 2 : vector<4x16x64xbf16>, vector<4x16x64xbf16>, vector<4x16x64xbf16> -> vector<4x16x192xbf16>
    %25 = vector.shape_cast %24 : vector<4x16x192xbf16> to vector<64x192xbf16>
    %c0_32 = arith.constant 0 : index
    %c0_33 = arith.constant 0 : index
    %26 = vector.load %arg5[%c0_32, %c0_33] : memref<192x12xbf16, #tpu.memory_space<vmem>>, vector<192x12xbf16>
    %cst_34 = arith.constant dense<0.000000e+00> : vector<64x12xf32>
    %27 = tpu.matmul %25, %26, %cst_34 {dimension_numbers = #tpu.dot_dimension_numbers<[1], [0], [0], [1], [0, 0, 1, 1], [], []>} : vector<64x192xbf16>, vector<192x12xbf16>, vector<64x12xf32> -> vector<64x12xf32>
    %c0_35 = arith.constant 0 : index
    %c0_36 = arith.constant 0 : index
    %28 = vector.load %arg6[%c0_35, %c0_36] : memref<1x12xf32, #tpu.memory_space<vmem>>, vector<1x12xf32>
    %29 = vector.broadcast %28 : vector<1x12xf32> to vector<64x12xf32>
    %30 = arith.addf %27, %29 : vector<64x12xf32>
    %31 = vector.shape_cast %30 : vector<64x12xf32> to vector<4x16x12xf32>
    %c0_37 = arith.constant 0 : index
    %c0_38 = arith.constant 0 : index
    %c0_39 = arith.constant 0 : index
    %32 = vector.load %arg7[%c0_37, %c0_38, %c0_39] : memref<4x16x12xf32, #tpu.memory_space<vmem>>, vector<4x16x12xf32>
    tpu.vector_store %arg7[%c0_37, %c0_38, %c0_39], %31 {strides = array<i32>} : memref<4x16x12xf32, #tpu.memory_space<vmem>>, vector<4x16x12xf32>,
    return
  }
  func.func @transform_0(%arg0: i32) -> (i32, i32, i32) {
    %c0_i32 = arith.constant 0 : i32
    %c0_i32_0 = arith.constant 0 : i32
    %c0_i32_1 = arith.constant 0 : i32
    return %arg0, %c0_i32, %c0_i32_0 : i32, i32, i32
  }
  func.func @transform_1(%arg0: i32) -> (i32, i32, i32) {
    %c0_i32 = arith.constant 0 : i32
    %c0_i32_0 = arith.constant 0 : i32
    %c0_i32_1 = arith.constant 0 : i32
    return %arg0, %c0_i32, %c0_i32_0 : i32, i32, i32
  }
  func.func @transform_2(%arg0: i32) -> (i32, i32) {
    %c0_i32 = arith.constant 0 : i32
    %c0_i32_0 = arith.constant 0 : i32
    %c0_i32_1 = arith.constant 0 : i32
    return %c0_i32, %c0_i32_0 : i32, i32
  }
  func.func @transform_3(%arg0: i32) -> (i32, i32) {
    %c0_i32 = arith.constant 0 : i32
    %c0_i32_0 = arith.constant 0 : i32
    %c0_i32_1 = arith.constant 0 : i32
    return %c0_i32, %c0_i32_0 : i32, i32
  }
  func.func @transform_4(%arg0: i32) -> (i32, i32) {
    %c0_i32 = arith.constant 0 : i32
    %c0_i32_0 = arith.constant 0 : i32
    %c0_i32_1 = arith.constant 0 : i32
    return %c0_i32, %c0_i32_0 : i32, i32
  }
  func.func @transform_5(%arg0: i32) -> (i32, i32) {
    %c0_i32 = arith.constant 0 : i32
    %c0_i32_0 = arith.constant 0 : i32
    %c0_i32_1 = arith.constant 0 : i32
    return %c0_i32, %c0_i32_0 : i32, i32
  }
  func.func @transform_6(%arg0: i32) -> (i32, i32, i32) {
    %c0_i32 = arith.constant 0 : i32
    %c0_i32_0 = arith.constant 0 : i32
    %c0_i32_1 = arith.constant 0 : i32
    return %arg0, %c0_i32, %c0_i32_0 : i32, i32, i32
  }
}

</mosaic_0001>

<bundles_post_ra>
// kernel: tpu_custom_call.1
= control target key start
LH: loop header
LB: loop body
LE: loop exit
PB: predicated region body
PF: predicated region fallthrough
CT: control target
= control target key end

     0   :  { %vm72_vm0 = vsmask.f32 7424  ;;  %vm141_vm1 = vcmask 1046528   ;;  %s1017_s21 = smov 64   ;;  %s1018_s8 = smov 32   ;;  %vm162_vm2 = vcmask 261120   ;;  %s1383_s0 = inlined_call_operand.vmem [shape: bf16[4,18,32], index: 0, kind: input, shape index: {}]   ;;  %s1384_s2 = inlined_call_operand.vmem [shape: bf16[96,64], index: 2, kind: input, shape index: {}]   ;;  %s1385_s1 = inlined_call_operand.vmem [shape: f32[4,16,1], index: 1, kind: input, shape index: {}]   ;;  %s1386_s4 = inlined_call_operand.vmem [shape: bf16[192,12], index: 4, kind: input, shape index: {}]   ;;  %s1387_s3 = inlined_call_operand.vmem [shape: f32[1,64], index: 3, kind: input, shape index: {}]   ;;  %s1388_s5 = inlined_call_operand.vmem [shape: f32[1,12], index: 5, kind: input, shape index: {}]   ;;  %s1389_s6 = inlined_call_operand.vmem [shape: f32[4,16,12], index: 6, kind: output, shape index: {}]  }
   0x1   :  { %v24_v0 = vld [vmem:[%s1383_s0] sm:$0xf]  ;;  %v25_v1 = vld [vmem:[%s1383_s0 + $0x4] sm:$0xf]  ;;  %v26_v7 = vld [vmem:[%s1383_s0 + $0xc] sm:$0xf] }
   0x2   :  { %v1061_v2 = vcombine.low %v24_v0, %v25_v1  ;;  %v976_v3 = vld [vmem:[%s1383_s0 + $0x8] ss:$0 sps:$4 sm:$0x11]   ;;  %v36_v4 = vld [vmem:[%s1383_s0] sm:$0xe]  ;;  %v989_v43 = vld [vmem:[%s1384_s2 + $0x10] sm:$0xff]  }
   0x3   :  { %v987_v5 = vld [vmem:[%s1384_s2] sm:$0xff]   ;;  %v880_v6 = vcombine.low %v36_v4, %v25_v1  ;;  %v27_v8 = vld [vmem:[%s1383_s0 + $0x10] sm:$0xf]  ;;  %v81_v11 = vshll.u32 %v976_v3, 16  ;;  %v143_v12 = vrot.slane %v976_v3, 1  ;;  %v988_v37 = vld [vmem:[%s1384_s2 + $0x8] sm:$0xff]  }
   0x4   :  { %v74_v9 = vshrl.u32 %v1061_v2, 16  ;;  %v76_v10 = vshll.u32 %v1061_v2, 16  ;;  %v37_v13 = vld [vmem:[%s1383_s0 + $0xc] sm:$0xe]  ;;  %950 = vmatprep.subr.bf16.mxu0 %v987_v5  ;;  %v1083_v15 = vcombine.low %v26_v7, %v27_v8  ;;  %v28_v18 = vld [vmem:[%s1383_s0 + $0x18] sm:$0xf] }
   0x5   :  { %v142_v14 = vrot.slane %v880_v6, 1  ;;  %v979_v16 = vld [vmem:[%s1383_s0 + $0x14] ss:$0 sps:$4 sm:$0x11]   ;;  %v881_v17 = vcombine.low %v37_v13, %v27_v8  ;;  %951 = vmatpush3.bf16.msra.mxu0 %v987_v5  ;;  %v83_v20 = vrot.slane %v81_v11, 1  ;;  %v990_v53 = vld [vmem:[%s1384_s2 + $0x18] sm:$0xff]  }
   0x6   :  { %v78_v19 = vrot.slane %v76_v10, 1  ;;  %v29_v21 = vld [vmem:[%s1383_s0 + $0x1c] sm:$0xf]  ;;  %v86_v23 = vshrl.u32 %v1083_v15, 16  ;;  %v88_v24 = vshll.u32 %v1083_v15, 16  ;;  %v93_v25 = vshll.u32 %v979_v16, 16  ;;  %952 = vmatprep.subr.bf16.mxu0 %v988_v37 }
   0x7   :  { %v144_v22 = vsel %vm141_vm1, %v142_v14, %v143_v12  ;;  %v982_v26 = vld [vmem:[%s1383_s0 + $0x20] ss:$0 sps:$4 sm:$0x11]   ;;  %v145_v28 = vrot.slane %v881_v17, 1  ;;  %v146_v29 = vrot.slane %v979_v16, 1  ;;  %v1101_v30 = vcombine.low %v28_v18, %v29_v21  ;;  %v992_v7 = vld [vmem:[%s1384_s2 + $0x28] sm:$0xff]  }
   0x8   :  { %v79_v27 = vor.u32 %v78_v19, %v74_v9  ;;  %154 = vrot.lane.b32.xlu1 %v144_v22, %s1017_s21  ;;  %v30_v31 = vld [vmem:[%s1383_s0 + $0x24] sm:$0xf]  ;;  %v31_v32 = vld [vmem:[%s1383_s0 + $0x28] sm:$0xf]  ;;  %v90_v33 = vrot.slane %v88_v24, 1  ;;  %v95_v34 = vrot.slane %v93_v25, 1 }
   0x9   :  { %v105_v35 = vshll.u32 %v982_v26, 16  ;;  %v1109_v36 = vcombine.low %v30_v31, %v31_v32  ;;  %v147_v39 = vsel %vm141_vm1, %v145_v28, %v146_v29  ;;  %v98_v40 = vshrl.u32 %v1101_v30, 16  ;;  %v984_v42 = vld [vmem:[%s1383_s0 + $0x2c] ss:$0 sps:$4 sm:$0x11]   ;;  %953 = vmatpush3.bf16.msra.mxu0 %v988_v37  ;;  %v991_v0 = vld [vmem:[%s1384_s2 + $0x20] sm:$0xff]  }
   0xa   :  { %v84_v38 = vsel %vm72_vm0, %v79_v27, %v83_v20  ;;  %v100_v41 = vshll.u32 %v1101_v30, 16  ;;  %v91_v44 = vor.u32 %v90_v33, %v86_v23  ;;  %v38_v47 = vld [vmem:[%s1383_s0 + $0x18] sm:$0xe]  ;;  %v117_v50 = vshll.u32 %v984_v42, 16  ;;  %v39_v52 = vld [vmem:[%s1383_s0 + $0x24] sm:$0xe]  ;;  %954 = vmatprep.subr.bf16.mxu0 %v989_v43 }
   0xb   :  { %121 = vrot.lane.b32.xlu0 %v84_v38, %s1018_s8  ;;  %v110_v45 = vshrl.u32 %v1109_v36, 16  ;;  %v112_v46 = vshll.u32 %v1109_v36, 16  ;;  %v107_v49 = vrot.slane %v105_v35, 1  ;;  %v882_v51 = vcombine.low %v38_v47, %v29_v21  ;;  %v318_v8 = vld [vmem:[%s1385_s1 + $0x8] sm:$0xff]  ;;  %v317_v9 = vld [vmem:[%s1385_s1] sm:$0xff]  ;;  %v319_v10 = vld [vmem:[%s1385_s1 + $0x10] sm:$0xff] }
   0xc   :  { %156 = vrot.lane.b32.xlu1 %v147_v39, %s1017_s21  ;;  %v102_v48 = vrot.slane %v100_v41, 1  ;;  %v96_v54 = vsel %vm72_vm0, %v91_v44, %v95_v34  ;;  %v149_v56 = vrot.slane %v982_v26, 1  ;;  %v883_v57 = vcombine.low %v39_v52, %v31_v32  ;;  %v320_v11 = vld [vmem:[%s1385_s1 + $0x18] sm:$0xff]  ;;  %v321_v12 = vld [vmem:[%s1385_s1 + $0x20] sm:$0xff]  ;;  %v322_v13 = vld [vmem:[%s1385_s1 + $0x28] sm:$0xff] }
   0xd   :  { %v114_v55 = vrot.slane %v112_v46, 1  ;;  %v119_v59 = vrot.slane %v117_v50, 1  ;;  %v152_v60 = vrot.slane %v984_v42, 1  ;;  %v148_v62 = vrot.slane %v882_v51, 1  ;;  %955 = vmatpush3.bf16.msra.mxu0 %v989_v43  ;;  %v323_v14 = vld [vmem:[%s1385_s1 + $0x30] sm:$0xff]  ;;  %v324_v16 = vld [vmem:[%s1385_s1 + $0x38] sm:$0xff] }
   0xe   :  { %v103_v58 = vor.u32 %v102_v48, %v98_v40  ;;  %v151_v63 = vrot.slane %v883_v57, 1  ;;  %956 = vmatprep.subr.bf16.mxu0 %v990_v53  ;;  %v1019_v5 = vmov 0   ;;  %vm171_vm3 = vcmask 523264   ;;  %v379_v33 = vld [vmem:[#allocation2 + $0xc] sm:$0x1]  ;;  %v1004_v51 = vld [vmem:[%s1386_s4 + $0x10] sm:$0xff]  }
   0xf   :  { %123 = vrot.lane.b32.xlu0 %v96_v54, %s1018_s8  ;;  %v115_v61 = vor.u32 %v114_v55, %v110_v45  ;;  %974 = vset.pattern.permute.xlu1 %v1019_v5  ;;  %v150_v6 = vsel %vm141_vm1, %v148_v62, %v149_v56  ;;  %vm235_vm4 = vcmask 785408   ;;  %vm373_vm5 = vcmask 516096   ;;  %v376_v35 = vld [vmem:[#allocation2] sm:$0x1]  ;;  %v393_v37 = vld [vmem:[#allocation2 + $0x14] sm:$0x1] }
  0x10   :  { %v108_v1 = vsel %vm72_vm0, %v103_v58, %v107_v49  ;;  %v153_v4 = vsel %vm141_vm1, %v151_v63, %v152_v60  ;;  %973 = vset.pattern.permute.xlu0 %v1019_v5  ;;  %794 = vmatprep.subr.bf16.mxu1 %v1019_v5  ;;  %vm374_vm6 = vsmask.f32 256  ;;  %vm388_vm8 = vsmask.f32 7938  ;;  %v390_v39 = vld [vmem:[#allocation2 + $0x8] sm:$0x1] }
  0x11   :  { %v120_v3 = vsel %vm72_vm0, %v115_v61, %v119_v59  ;;  %957 = vmatpush3.bf16.msra.mxu0 %v990_v53  ;;  %vm1193_vm7 = vmand %vm373_vm5, %vm374_vm6  ;;  %v385_v41 = vld [vmem:[#allocation2 + $0x24] sm:$0x1]  ;;  %v382_v43 = vld [vmem:[#allocation2 + $0x18] sm:$0x1]  ;;  %vm508_vm10 = vcmask 519168   ;;  %vm859_vm14 = vcmask 97280  }
  0x12   :  { %127 = vrot.lane.b32.xlu1 %v120_v3, %s1018_s8  ;;  %958 = vmatprep.subr.bf16.mxu0 %v991_v0  ;;  %vm1200_vm9 = vmand %vm373_vm5, %vm388_vm8  ;;  %v386_v42 = vsel %vm1193_vm7, 0, %v385_v41  ;;  %v383_v44 = vsel %vm1193_vm7, 0, %v382_v43  ;;  %v399_v45 = vld [vmem:[#allocation2 + $0x2c] sm:$0x1]  ;;  %v396_v47 = vld [vmem:[#allocation2 + $0x20] sm:$0x1] }
  0x13   :  { %125 = vrot.lane.b32.xlu0 %v108_v1, %s1018_s8  ;;  %v394_v38 = vsel %vm1200_vm9, 0, %v393_v37  ;;  %v391_v40 = vsel %vm1200_vm9, 0, %v390_v39  ;;  %387 = vst [vmem:[#allocation2 + $0x24] sm:$0x1] %v386_v42  ;;  %384 = vst [vmem:[#allocation2 + $0x18] sm:$0x1] %v383_v44 }
  0x14   :  { %395 = vst [vmem:[#allocation2 + $0x14] sm:$0x1] %v394_v38  ;;  %392 = vst [vmem:[#allocation2 + $0x8] sm:$0x1] %v391_v40  ;;  %v400_v46 = vsel %vm1200_vm9, 0, %v399_v45  ;;  %v397_v48 = vsel %vm1200_vm9, 0, %v396_v47 }
  0x15   :  { %959 = vmatpush3.bf16.msra.mxu0 %v991_v0  ;;  %401 = vst [vmem:[#allocation2 + $0x2c] sm:$0x1] %v400_v46  ;;  %398 = vst [vmem:[#allocation2 + $0x20] sm:$0x1] %v397_v48  ;;  %v1002_v49 = vld [vmem:[%s1386_s4] sm:$0xff]   ;;  %v1003_v50 = vld [vmem:[%s1386_s4 + $0x8] sm:$0xff]  }
  0x16   :  { %160 = vrot.lane.b32.xlu1 %v153_v4, %s1017_s21  ;;  %960 = vmatprep.subr.bf16.mxu0 %v992_v7  ;;  %v1005_v52 = vld [vmem:[%s1386_s4 + $0x18] sm:$0xff]   ;;  %v1006_v53 = vld [vmem:[%s1386_s4 + $0x20] sm:$0xff]   ;;  %v1007_v54 = vld [vmem:[%s1386_s4 + $0x28] sm:$0xff]   ;;  %vm426_vm11 = vsmask.f32 4368 }
  0x17   :  { %158 = vrot.lane.b32.xlu0 %v150_v6, %s1017_s21  ;;  %795 = vmatpush1.bf16.msra.mxu1 %v1002_v49  ;;  %v1008_v55 = vld [vmem:[%s1386_s4 + $0x30] sm:$0xff]   ;;  %v1009_v56 = vld [vmem:[%s1386_s4 + $0x38] sm:$0xff]   ;;  %v1010_v57 = vld [vmem:[%s1386_s4 + $0x40] sm:$0xff]  }
  0x18   :  { %796 = vmatprep.subr.bf16.mxu1 %v1019_v5  ;;  %v1011_v58 = vld [vmem:[%s1386_s4 + $0x48] sm:$0xff]   ;;  %v1012_v59 = vld [vmem:[%s1386_s4 + $0x50] sm:$0xff]   ;;  %v1013_v60 = vld [vmem:[%s1386_s4 + $0x58] sm:$0xff]  }
  0x19   :  { %961 = vmatpush3.bf16.msra.mxu0 %v992_v7  ;;  %v1268_v62 = vld [vmem:[%s1387_s3] ss:$0 sm:$0xff]  ;;  %vm1278_vm12 = vmand %vm508_vm10, %vm388_vm8 }
  0x1a   :  { %332 = vperm.xlu1 %974, %v318_v8   ;;  %vm1284_vm13 = vmor %vm374_vm6, %vm426_vm11 }
  0x1b   :  { %327 = vperm.xlu0 %973, %v317_v9   ;;  %797 = vmatpush1.bf16.msra.mxu1 %v1003_v50 }
  0x1c   :  { %798 = vmatprep.subr.bf16.mxu1 %v1019_v5 }
  0x1e   :  { %337 = vperm.xlu1 %974, %v319_v10  }
  0x1f   :  { %342 = vperm.xlu0 %973, %v320_v11   ;;  %799 = vmatpush1.bf16.msra.mxu1 %v1004_v51 }
  0x20   :  { %800 = vmatprep.subr.bf16.mxu1 %v1019_v5 }
  0x22   :  { %347 = vperm.xlu1 %974, %v321_v12  }
  0x23   :  { %352 = vperm.xlu0 %973, %v322_v13   ;;  %801 = vmatpush1.bf16.msra.mxu1 %v1005_v52 }
  0x24   :  { %802 = vmatprep.subr.bf16.mxu1 %v1019_v5 }
  0x26   :  { %357 = vperm.xlu1 %974, %v323_v14  }
  0x27   :  { %362 = vperm.xlu0 %973, %v324_v16   ;;  %803 = vmatpush1.bf16.msra.mxu1 %v1006_v53  ;;  %v522_v53 = vld [vmem:[#allocation2 + $0x14] sm:$0x1] }
  0x28   :  { %804 = vmatprep.subr.bf16.mxu1 %v1019_v5 }
  0x2b   :  { %805 = vmatpush1.bf16.msra.mxu1 %v1007_v54 }
  0x2c   :  { %806 = vmatprep.subr.bf16.mxu1 %v1019_v5 }
  0x2f   :  { %807 = vmatpush1.bf16.msra.mxu1 %v1008_v55 }
  0x30   :  { %808 = vmatprep.subr.bf16.mxu1 %v1019_v5 }
  0x33   :  { %809 = vmatpush1.bf16.msra.mxu1 %v1009_v56 }
  0x34   :  { %810 = vmatprep.subr.bf16.mxu1 %v1019_v5 }
  0x37   :  { %811 = vmatpush1.bf16.msra.mxu1 %v1010_v57 }
  0x38   :  { %812 = vmatprep.subr.bf16.mxu1 %v1019_v5 }
  0x3b   :  { %813 = vmatpush1.bf16.msra.mxu1 %v1011_v58 }
  0x3c   :  { %814 = vmatprep.subr.bf16.mxu1 %v1019_v5 }
  0x3f   :  { %815 = vmatpush1.bf16.msra.mxu1 %v1012_v59  ;;  %v515_v59 = vld [vmem:[#allocation2 + $0x8] sm:$0x1] }
  0x40   :  { %816 = vmatprep.subr.bf16.mxu1 %v1019_v5 }
  0x43   :  { %817 = vmatpush1.bf16.msra.mxu1 %v1013_v60 }
  0x7a   :  { %v155_v17 = vpop.permute.xlu1 %154 }
  0x7d   :  { %v122_v18 = vpop.permute.xlu0 %121 }
  0x7e   :  { %v164_v19 = vsel %vm162_vm2, %v1061_v2, %v122_v18  ;;  %v157_v20 = vpop.permute.xlu1 %156 }
  0x7f   :  { %v173_v21 = vsel %vm171_vm3, %v164_v19, %v155_v17 }
  0x80   :  { %962 = vmatprep.mubr.msk.bf16.mxu0 %vm235_vm4, %v173_v21 }
  0x81   :  { %v124_v22 = vpop.permute.xlu0 %123 }
  0x82   :  { %v166_v23 = vsel %vm162_vm2, %v1083_v15, %v124_v22 }
  0x83   :  { %v175_v24 = vsel %vm171_vm3, %v166_v23, %v157_v20 }
  0x84   :  { %963 = vmatmul.mubr.msk.bf16.vlgmr.msra.gmra.mrb[0].mxu0 %vm235_vm4, %v175_v24  ;;  %v128_v25 = vpop.permute.xlu1 %127 }
  0x85   :  { %v126_v26 = vpop.permute.xlu0 %125  ;;  %v170_v27 = vsel %vm162_vm2, %v1109_v36, %v128_v25  ;;  %v377_v36 = vsel %vm1193_vm7, 0, %v376_v35 }
  0x86   :  { %v168_v28 = vsel %vm162_vm2, %v1101_v30, %v126_v26  ;;  %v380_v30 = vsel %vm1193_vm7, 0, %v379_v33  ;;  %378 = vst [vmem:[#allocation2] sm:$0x1] %v377_v36 }
  0x87   :  { %381 = vst [vmem:[#allocation2 + $0xc] sm:$0x1] %v380_v30 }
  0x88   :  { %v161_v29 = vpop.permute.xlu1 %160 }
  0x89   :  { %v159_v2 = vpop.permute.xlu0 %158  ;;  %v179_v31 = vsel %vm171_vm3, %v170_v27, %v161_v29 }
  0x8a   :  { %v177_v32 = vsel %vm171_vm3, %v168_v28, %v159_v2 }
  0x8b   :  { %966 = vmatprep.mubr.msk.bf16.mxu0 %vm235_vm4, %v177_v32 }
  0x8c   :  { %967 = vmatmul.mubr.msk.bf16.gmra.mrb[4].mxu0 %vm235_vm4, %v179_v31 }
  0x8d   :  { %v510_v47 = vld [vmem:[#allocation2] sm:$0xf] }
  0x8e   :  { %v518_v39 = vld [vmem:[#allocation2 + $0xc] sm:$0xf] }
  0x99   :  { %v333_v61 = vpop.permute.xlu1 %332 }
  0x9a   :  { %v328_v63 = vpop.permute.xlu0 %327 }
  0x9d   :  { %v338_v0 = vpop.permute.xlu1 %337 }
  0x9e   :  { %v343_v14 = vpop.permute.xlu0 %342 }
  0xa1   :  { %v348_v17 = vpop.permute.xlu1 %347 }
  0xa5   :  { %v358_v43 = vpop.permute.xlu1 %357 }
 0x157   :  { %v964_v1 = vpop.f32.mrb[0].mxu0 }
 0x158   :  { %v287_v3 = vadd.f32 %v964_v1, %v1268_v62  ;;  %v278_v4 = vpop.f32.mrb[1].mxu0  ;;  %v353_v1 = vpop.permute.xlu0 %352 }
 0x159   :  { %v279_v6 = vadd.f32 %v1268_v62, %v278_v4  ;;  %v965_v7 = vpop.f32.mrb[2].mxu0 }
 0x15a   :  { %v311_v8 = vmax.f32 %v287_v3, 0.0  ;;  %v290_v9 = vadd.f32 %v965_v7, %v1268_v62  ;;  %v281_v5 = vpop.f32.mrb[3].mxu0 }
 0x15b   :  { %v309_v10 = vmax.f32 %v279_v6, 0.0  ;;  %v282_v11 = vadd.f32 %v1268_v62, %v281_v5 }
 0x15c   :  { %v367_v12 = vmul.f32 %v338_v0, %v311_v8  ;;  %v312_v13 = vmax.f32 %v290_v9, 0.0 }
 0x15d   :  { %v365_v16 = vmul.f32 %v328_v63, %v309_v10  ;;  %v310_v18 = vmax.f32 %v282_v11, 0.0 }
 0x15e   :  { %v934_v19 = vpack.c.bf16 %v367_v12, %v367_v12  ;;  %v368_v20 = vmul.f32 %v343_v14, %v312_v13  ;;  %v532_v14 = vld [vmem:[#allocation2 + $0x24] sm:$0xf] }
 0x15f   :  { %v932_v21 = vpack.c.bf16 %v365_v16, %v365_v16  ;;  %v366_v22 = vmul.f32 %v333_v61, %v310_v18  ;;  %v968_v23 = vpop.f32.mrb[4].mxu0 }
 0x160   :  { %v446_v24 = vshrl.u32 %v934_v19, 16  ;;  %v449_v25 = vshll.u32 %v934_v19, 16  ;;  %v935_v26 = vpack.c.bf16 %v368_v20, %v368_v20  ;;  %v303_v27 = vadd.f32 %v968_v23, %v1268_v62  ;;  %v294_v28 = vpop.f32.mrb[5].mxu0  ;;  %v525_v19 = vld [vmem:[#allocation2 + $0x18] sm:$0xf] }
 0x161   :  { %v429_v29 = vshrl.u32 %v932_v21, 16  ;;  %v432_v2 = vshll.u32 %v932_v21, 16  ;;  %v933_v31 = vpack.c.bf16 %v366_v22, %v366_v22  ;;  %v295_v32 = vadd.f32 %v1268_v62, %v294_v28  ;;  %v969_v33 = vpop.f32.mrb[6].mxu0  ;;  %v363_v22 = vpop.permute.xlu0 %362 }
 0x162   :  { %v448_v30 = vrot.slane %v446_v24, 7  ;;  %v454_v34 = vshrl.u32 %v935_v26, 16  ;;  %v457_v35 = vshll.u32 %v935_v26, 16  ;;  %v315_v36 = vmax.f32 %v303_v27, 0.0  ;;  %v297_v37 = vpop.f32.mrb[7].mxu0 }
 0x163   :  { %v431_v40 = vrot.slane %v429_v29, 7  ;;  %v437_v41 = vshrl.u32 %v933_v31, 16  ;;  %v440_v42 = vshll.u32 %v933_v31, 16  ;;  %v313_v44 = vmax.f32 %v295_v32, 0.0 }
 0x164   :  { %v451_v45 = vor.u32 %v449_v25, %v448_v30  ;;  %v452_v46 = vrot.slane %v448_v30, 4  ;;  %v456_v48 = vrot.slane %v454_v34, 7  ;;  %v371_v49 = vmul.f32 %v358_v43, %v315_v36 }
 0x165   :  { %v434_v50 = vor.u32 %v432_v2, %v431_v40  ;;  %v435_v51 = vrot.slane %v431_v40, 4  ;;  %v439_v54 = vrot.slane %v437_v41, 7  ;;  %v369_v55 = vmul.f32 %v348_v17, %v313_v44 }
 0x166   :  { %v519_v56 = vsel %vm1278_vm12, %v451_v45, %v518_v39  ;;  %v459_v57 = vor.u32 %v457_v35, %v456_v48  ;;  %v461_v58 = vrot.slane %v456_v48, 4  ;;  %v938_v60 = vpack.c.bf16 %v371_v49, %v371_v49 }
 0x167   :  { %520 = vst [vmem:[#allocation2 + $0xc] sm:$0xf] %v519_v56  ;;  %v511_v61 = vsel %vm1278_vm12, %v434_v50, %v510_v47  ;;  %v442_v63 = vor.u32 %v440_v42, %v439_v54  ;;  %v444_v0 = vrot.slane %v439_v54, 4  ;;  %v936_v3 = vpack.c.bf16 %v369_v55, %v369_v55  ;;  %v536_v47 = vld [vmem:[#allocation2 + $0x2c] sm:$0x1] }
 0x168   :  { %512 = vst [vmem:[#allocation2] sm:$0xf] %v511_v61  ;;  %v460_v4 = vsel %vm1284_vm13, %v452_v46, %v459_v57  ;;  %v523_v6 = vsel %vm1193_vm7, %v461_v58, %v522_v53  ;;  %v480_v7 = vshrl.u32 %v938_v60, 16  ;;  %v483_v11 = vshll.u32 %v938_v60, 16 }
 0x169   :  { %521 = vst.msk [vmem:[#allocation2 + $0x10] sm:$0xf] %vm508_vm10, %v460_v4  ;;  %524 = vst [vmem:[#allocation2 + $0x14] sm:$0x1] %v523_v6  ;;  %v443_v8 = vsel %vm1284_vm13, %v435_v51, %v442_v63  ;;  %v516_v9 = vsel %vm1193_vm7, %v444_v0, %v515_v59  ;;  %v463_v5 = vshrl.u32 %v936_v3, 16  ;;  %v306_v12 = vadd.f32 %v969_v33, %v1268_v62 }
 0x16a   :  { %514 = vst.msk [vmem:[#allocation2 + $0x4] sm:$0xf] %vm508_vm10, %v443_v8  ;;  %517 = vst [vmem:[#allocation2 + $0x8] sm:$0x1] %v516_v9  ;;  %v482_v10 = vrot.slane %v480_v7, 7  ;;  %v298_v13 = vadd.f32 %v1268_v62, %v297_v37  ;;  %v466_v17 = vshll.u32 %v936_v3, 16 }
 0x16b   :  { %v465_v16 = vrot.slane %v463_v5, 7  ;;  %v316_v20 = vmax.f32 %v306_v12, 0.0  ;;  %v529_v51 = vld [vmem:[#allocation2 + $0x20] sm:$0x1] }
 0x16c   :  { %v485_v18 = vor.u32 %v483_v11, %v482_v10  ;;  %v314_v21 = vmax.f32 %v298_v13, 0.0  ;;  %v486_v27 = vrot.slane %v482_v10, 4 }
 0x16d   :  { %v468_v23 = vor.u32 %v466_v17, %v465_v16  ;;  %v372_v25 = vmul.f32 %v363_v22, %v316_v20  ;;  %v469_v28 = vrot.slane %v465_v16, 4 }
 0x16e   :  { %v533_v24 = vsel %vm1278_vm12, %v485_v18, %v532_v14  ;;  %v370_v26 = vmul.f32 %v353_v1, %v314_v21  ;;  %v541_v29 = vld [vmem:[#allocation2 + $0xc] sm:$0xf] }
 0x16f   :  { %534 = vst [vmem:[#allocation2 + $0x24] sm:$0xf] %v533_v24  ;;  %v526_v62 = vsel %vm1278_vm12, %v468_v23, %v525_v19  ;;  %v939_v2 = vpack.c.bf16 %v372_v25, %v372_v25  ;;  %v552_v33 = vld [vmem:[#allocation2 + $0xc] sm:$0xe]  ;;  %v539_v30 = vld [vmem:[#allocation2] sm:$0xf] }
 0x170   :  { %527 = vst [vmem:[#allocation2 + $0x18] sm:$0xf] %v526_v62  ;;  %v937_v31 = vpack.c.bf16 %v370_v26, %v370_v26  ;;  %v542_v32 = vld [vmem:[#allocation2 + $0x10] sm:$0xf]  ;;  %v551_v41 = vld [vmem:[#allocation2] sm:$0xe] }
 0x171   :  { %v540_v34 = vld [vmem:[#allocation2 + $0x4] sm:$0xf]  ;;  %v1308_v35 = vcombine.low %v541_v29, %v542_v32  ;;  %v488_v36 = vshrl.u32 %v939_v2, 16  ;;  %v491_v37 = vshll.u32 %v939_v2, 16  ;;  %v912_v45 = vcombine.low %v552_v33, %v542_v32 }
 0x172   :  { %v471_v39 = vshrl.u32 %v937_v31, 16  ;;  %v474_v40 = vshll.u32 %v937_v31, 16  ;;  %v1310_v42 = vcombine.low %v539_v30, %v540_v34  ;;  %v994_v43 = vld [vmem:[#allocation2 + $0x8] ss:$0 sps:$4 sm:$0x11]   ;;  %v911_v38 = vcombine.low %v551_v41, %v540_v34 }
 0x173   :  { %v997_v44 = vld [vmem:[#allocation2 + $0x14] ss:$0 sps:$4 sm:$0x11]   ;;  %v490_v46 = vrot.slane %v488_v36, 7  ;;  %v600_v49 = vshrl.u32 %v1308_v35, 16  ;;  %v602_v50 = vshll.u32 %v1308_v35, 16 }
 0x174   :  { %v473_v48 = vrot.slane %v471_v39, 7  ;;  %v655_v53 = vrot.slane %v911_v38, 1  ;;  %v656_v54 = vrot.slane %v994_v43, 1  ;;  %v607_v55 = vshll.u32 %v997_v44, 16 }
 0x175   :  { %v588_v56 = vshrl.u32 %v1310_v42, 16  ;;  %v493_v57 = vor.u32 %v491_v37, %v490_v46  ;;  %v495_v58 = vrot.slane %v490_v46, 4  ;;  %v604_v63 = vrot.slane %v602_v50, 1 }
 0x176   :  { %v476_v59 = vor.u32 %v474_v40, %v473_v48  ;;  %v478_v60 = vrot.slane %v473_v48, 4  ;;  %v657_v61 = vsel %vm141_vm1, %v655_v53, %v656_v54  ;;  %v609_v0 = vrot.slane %v607_v55, 1  ;;  %v545_v16 = vld [vmem:[#allocation2 + $0x24] sm:$0xf] }
 0x177   :  { %v590_v1 = vshll.u32 %v1310_v42, 16  ;;  %v494_v3 = vsel %vm1284_vm13, %v486_v27, %v493_v57  ;;  %v537_v4 = vsel %vm1193_vm7, %v495_v58, %v536_v47  ;;  %928 = vmatprep.mubr.msk.bf16.mxu1 %vm171_vm3, %v657_v61  ;;  %v605_v8 = vor.u32 %v604_v63, %v600_v49  ;;  %v543_v17 = vld [vmem:[#allocation2 + $0x18] sm:$0xf]  ;;  %v554_v19 = vld [vmem:[#allocation2 + $0x24] sm:$0xe] }
 0x178   :  { %v477_v6 = vsel %vm1284_vm13, %v469_v28, %v476_v59  ;;  %v530_v7 = vsel %vm1193_vm7, %v478_v60, %v529_v51  ;;  %535 = vst.msk [vmem:[#allocation2 + $0x28] sm:$0xf] %vm508_vm10, %v494_v3  ;;  %538 = vst [vmem:[#allocation2 + $0x2c] sm:$0x1] %v537_v4  ;;  %v595_v5 = vshll.u32 %v994_v43, 16  ;;  %v658_v10 = vrot.slane %v912_v45, 1 }
 0x179   :  { %528 = vst.msk [vmem:[#allocation2 + $0x1c] sm:$0xf] %vm508_vm10, %v477_v6  ;;  %531 = vst [vmem:[#allocation2 + $0x20] sm:$0x1] %v530_v7  ;;  %v592_v9 = vrot.slane %v590_v1, 1  ;;  %v659_v11 = vrot.slane %v997_v44, 1  ;;  %v610_v12 = vsel %vm72_vm0, %v605_v8, %v609_v0 }
 0x17a   :  { %v597_v13 = vrot.slane %v595_v5, 1  ;;  %637 = vrot.lane.b32.xlu0 %v610_v12, %s1017_s21  ;;  %v553_v18 = vld [vmem:[#allocation2 + $0x18] sm:$0xe] }
 0x17b   :  { %v593_v52 = vor.u32 %v592_v9, %v588_v56  ;;  %v660_v15 = vsel %vm141_vm1, %v658_v10, %v659_v11 }
 0x17d   :  { %v598_v14 = vsel %vm72_vm0, %v593_v52, %v597_v13 }
 0x17e   :  { %635 = vrot.lane.b32.xlu1 %v598_v14, %s1017_s21 }
 0x17f   :  { %v546_v20 = vld [vmem:[#allocation2 + $0x28] sm:$0xf]  ;;  %v999_v23 = vld [vmem:[#allocation2 + $0x2c] ss:$0 sps:$4 sm:$0x11]  }
 0x180   :  { %v544_v21 = vld [vmem:[#allocation2 + $0x1c] sm:$0xf]  ;;  %v906_v22 = vcombine.low %v545_v16, %v546_v20  ;;  %v914_v26 = vcombine.low %v554_v19, %v546_v20  ;;  %v1001_v27 = vld [vmem:[#allocation2 + $0x20] ss:$0 sps:$4 sm:$0x11]   ;;  %v631_v62 = vshll.u32 %v999_v23, 16 }
 0x181   :  { %v905_v24 = vcombine.low %v543_v17, %v544_v21  ;;  %v913_v25 = vcombine.low %v553_v18, %v544_v21  ;;  %v619_v2 = vshll.u32 %v1001_v27, 16  ;;  %v662_v32 = vrot.slane %v1001_v27, 1 }
 0x182   :  { %v626_v28 = vshll.u32 %v906_v22, 16  ;;  %v624_v33 = vshrl.u32 %v906_v22, 16  ;;  %v664_v34 = vrot.slane %v914_v26, 1  ;;  %v665_v36 = vrot.slane %v999_v23, 1 }
 0x183   :  { %v614_v29 = vshll.u32 %v905_v24, 16  ;;  %v661_v31 = vrot.slane %v913_v25, 1  ;;  %v612_v37 = vshrl.u32 %v905_v24, 16  ;;  %v633_v43 = vrot.slane %v631_v62, 1 }
 0x184   :  { %v628_v30 = vrot.slane %v626_v28, 1  ;;  %v666_v38 = vsel %vm141_vm1, %v664_v34, %v665_v36  ;;  %v621_v45 = vrot.slane %v619_v2, 1 }
 0x185   :  { %v616_v39 = vrot.slane %v614_v29, 1  ;;  %v663_v40 = vsel %vm141_vm1, %v661_v31, %v662_v32 }
 0x186   :  { %v629_v41 = vor.u32 %v628_v30, %v624_v33 }
 0x187   :  { %v617_v44 = vor.u32 %v616_v39, %v612_v37 }
 0x188   :  { %v634_v46 = vsel %vm72_vm0, %v629_v41, %v633_v43 }
 0x189   :  { %641 = vrot.lane.b32.xlu0 %v634_v46, %s1017_s21  ;;  %v622_v47 = vsel %vm72_vm0, %v617_v44, %v621_v45 }
 0x18a   :  { %639 = vrot.lane.b32.xlu1 %v622_v47, %s1017_s21 }
 0x1ec   :  { %v638_v50 = vpop.permute.xlu0 %637 }
 0x1ed   :  { %v671_v51 = vsel %vm171_vm3, %v1308_v35, %v638_v50 }
 0x1f0   :  { %v636_v48 = vpop.permute.xlu1 %635 }
 0x1f1   :  { %v668_v49 = vsel %vm171_vm3, %v1310_v42, %v636_v48  ;;  %v915_v42 = vld [vmem:[%s1388_s5] ss:$0 sm:$0xff] }
 0x1f2   :  { %827 = vmatmul.mubr.bf16.vlgmr.msra.gmra.mrb[0].mxu1 %v668_v49 }
 0x1f3   :  { %929 = vmatprep.mubr.msk.bf16.mxu1 %vm171_vm3, %v660_v15 }
 0x1fa   :  { %835 = vmatmul.mubr.bf16.gmra.mrb[4].mxu1 %v671_v51 }
 0x1fb   :  { %930 = vmatprep.mubr.msk.bf16.mxu1 %vm171_vm3, %v663_v40  ;;  %v642_v55 = vpop.permute.xlu0 %641 }
 0x1fc   :  { %v640_v53 = vpop.permute.xlu1 %639  ;;  %v677_v56 = vsel %vm171_vm3, %v906_v22, %v642_v55 }
 0x1fd   :  { %v674_v54 = vsel %vm171_vm3, %v905_v24, %v640_v53 }
 0x202   :  { %843 = vmatmul.mubr.bf16.gmra.mrb[8].mxu1 %v674_v54 }
 0x203   :  { %931 = vmatprep.mubr.msk.bf16.mxu1 %vm171_vm3, %v666_v38 }
 0x20a   :  { %851 = vmatmul.mubr.bf16.gmra.mrb[12].mxu1 %v677_v56 }
 0x2c5   :  { %v828_v57 = vpop.f32.mrb[0].mxu1 }
 0x2c6   :  { %v829_v35 = vadd.f32 %v915_v42, %v828_v57  ;;  %v830_v58 = vpop.f32.mrb[1].mxu1 }
 0x2c7   :  { %v831_v59 = vpop.f32.mrb[2].mxu1 }
 0x2c8   :  { %860 = vst.msk [vmem:[%s1389_s6] sm:$0xff] %vm859_vm14, %v829_v35  ;;  %v832_v60 = vadd.f32 %v915_v42, %v831_v59  ;;  %v833_v61 = vpop.f32.mrb[3].mxu1 }
 0x2ca   :  { %861 = vst.msk [vmem:[%s1389_s6 + $0x8] sm:$0xff] %vm859_vm14, %v832_v60 }
 0x2cd   :  { %v836_v63 = vpop.f32.mrb[4].mxu1 }
 0x2ce   :  { %v837_v0 = vadd.f32 %v915_v42, %v836_v63  ;;  %v838_v1 = vpop.f32.mrb[5].mxu1 }
 0x2cf   :  { %v839_v3 = vpop.f32.mrb[6].mxu1 }
 0x2d0   :  { %862 = vst.msk [vmem:[%s1389_s6 + $0x10] sm:$0xff] %vm859_vm14, %v837_v0  ;;  %v840_v4 = vadd.f32 %v915_v42, %v839_v3  ;;  %v841_v6 = vpop.f32.mrb[7].mxu1 }
 0x2d2   :  { %863 = vst.msk [vmem:[%s1389_s6 + $0x18] sm:$0xff] %vm859_vm14, %v840_v4 }
 0x2d5   :  { %v844_v7 = vpop.f32.mrb[8].mxu1 }
 0x2d6   :  { %v845_v8 = vadd.f32 %v915_v42, %v844_v7  ;;  %v846_v9 = vpop.f32.mrb[9].mxu1 }
 0x2d7   :  { %v847_v5 = vpop.f32.mrb[10].mxu1 }
 0x2d8   :  { %864 = vst.msk [vmem:[%s1389_s6 + $0x20] sm:$0xff] %vm859_vm14, %v845_v8  ;;  %v848_v10 = vadd.f32 %v915_v42, %v847_v5  ;;  %v849_v11 = vpop.f32.mrb[11].mxu1 }
 0x2da   :  { %865 = vst.msk [vmem:[%s1389_s6 + $0x28] sm:$0xff] %vm859_vm14, %v848_v10 }
 0x2dd   :  { %v852_v12 = vpop.f32.mrb[12].mxu1 }
 0x2de   :  { %v853_v52 = vadd.f32 %v915_v42, %v852_v12  ;;  %v854_v13 = vpop.f32.mrb[13].mxu1 }
 0x2df   :  { %v855_v15 = vpop.f32.mrb[14].mxu1 }
 0x2e0   :  { %866 = vst.msk [vmem:[%s1389_s6 + $0x30] sm:$0xff] %vm859_vm14, %v853_v52  ;;  %v856_v14 = vadd.f32 %v915_v42, %v855_v15  ;;  %v857_v16 = vpop.f32.mrb[15].mxu1 }
 0x2e2   :  { %867 = vst.msk [vmem:[%s1389_s6 + $0x38] sm:$0xff] %vm859_vm14, %v856_v14 }

</bundles_post_ra>
